<compile_context>
chip_gen: v7x
topology: tpu7x:2x2x1
jax: 0.10.0
libtpu: 0.0.40
codegen_flags: <defaults>
</compile_context>

<pallas_src>
import functools

import jax
import jax.numpy as jnp
from jax.experimental import pallas as pl
from jax.experimental.pallas import tpu as pltpu

LANE = 128
SUBLANE = 8


def _round_up(x, m):
    return (x + m - 1) // m * m


def _pick_vmem_limit():
    # Generation-aware VMEM budget: ~half of physical, never above 48 MiB
    # (v7x has 64 MiB/TC; v5e/v6e have 128 MiB).
    try:
        cap = pltpu.get_tpu_info().vmem_capacity_bytes
    except Exception:
        cap = 64 * 1024 * 1024  # conservative (v7x per-TC) fallback
    return min(max(cap // 2, 16 * 1024 * 1024), 48 * 1024 * 1024)


def _myloss_kernel(out_ref, mask_ref, score_ref, inter_acc, mask_acc, *,
                   tail_cols):
    # out_ref / mask_ref: (block_n, tile_d) input tiles (native dtype).
    # score_ref: (block_n, 1) f32 output, resident across the reduction axis.
    # inter_acc / mask_acc: (block_n, 1) f32 VMEM scratch accumulators.
    # tail_cols: static Python int (valid columns of the LAST k tile) or None.
    k = pl.program_id(1)
    nk = pl.num_programs(1)

    @pl.when(k == 0)
    def _init():
        inter_acc[...] = jnp.zeros_like(inter_acc)
        mask_acc[...] = jnp.zeros_like(mask_acc)

    def accumulate(valid):
        m1 = out_ref[...].astype(jnp.float32)
        m2 = mask_ref[...].astype(jnp.float32)
        prod = m1 * m2
        if valid is not None:
            # Mask BOTH sums on the partial last tile (OOB lanes hold garbage).
            prod = jnp.where(valid, prod, 0.0)
            m2 = jnp.where(valid, m2, 0.0)
        inter_acc[...] += jnp.sum(prod, axis=1, keepdims=True)
        mask_acc[...] += jnp.sum(m2, axis=1, keepdims=True)

    if tail_cols is None:
        accumulate(None)
    else:
        @pl.when(k < nk - 1)
        def _body():
            accumulate(None)

        @pl.when(k == nk - 1)
        def _tail():
            col = jax.lax.broadcasted_iota(jnp.int32, out_ref.shape, 1)
            accumulate(col < tail_cols)

    @pl.when(k == nk - 1)
    def _finalize():
        smooth = jnp.float32(1e-08)
        score_ref[...] = (inter_acc[...] + smooth) / (mask_acc[...] + smooth)


def myloss(output, mask, *, target_block_bytes=4 * 1024 * 1024):
    """Myloss forward with a tiled, pipelined Pallas TPU kernel.

    output, mask: arrays with leading batch dim N (e.g. NCHW).  Any dtype
    (f32/bf16 output, f32/bf16/int8/bool mask) — cast happens in-kernel, so
    low-precision inputs directly halve/quarter HBM traffic.  Returns (N,) f32.
    """
    n = output.shape[0]
    m1 = output.reshape(n, -1)   # free row-major view, matches torch .view
    m2 = mask.reshape(n, -1)
    d = m1.shape[1]
    assert m2.shape == (n, d), (m1.shape, m2.shape)

    esz = m1.dtype.itemsize + m2.dtype.itemsize   # bytes moved per element pair

    vmem_limit = _pick_vmem_limit()
    tbb = min(max(int(target_block_bytes), 64 * 1024), vmem_limit // 4)

    # ---- reduction (D) tiling: tile_d multiple of 128 (or == d); no padding.
    max_tile_elems = max(LANE, (tbb // (SUBLANE * esz)) // LANE * LANE)
    if d <= max_tile_elems:
        tile_d, num_k, tail = d, 1, None
    else:
        num_k = pl.cdiv(d, max_tile_elems)
        tile_d = _round_up(pl.cdiv(d, num_k), LANE)
        if tile_d >= d:
            tile_d, num_k, tail = d, 1, None
        else:
            num_k = pl.cdiv(d, tile_d)
            rem = d - (num_k - 1) * tile_d
            tail = rem if rem != tile_d else None

    # ---- batch (N) tiling: block_n multiple of 8 (or == n); sized by bytes.
    desired_bn = max(1, tbb // max(1, tile_d * esz))
    block_n = max(SUBLANE, _round_up(desired_bn, SUBLANE))
    if n >= 2 * SUBLANE:
        # Keep >= 2 batch tiles so the "parallel" axis can span both v7x TCs.
        block_n = min(block_n, _round_up(pl.cdiv(n, 2), SUBLANE))
    if block_n >= n:
        block_n = n
    num_i = pl.cdiv(n, block_n)

    grid = (num_i, num_k)
    kernel = functools.partial(_myloss_kernel, tail_cols=tail)

    score = pl.pallas_call(
        kernel,
        out_shape=jax.ShapeDtypeStruct((n, 1), jnp.float32),
        grid=grid,
        in_specs=[
            pl.BlockSpec((block_n, tile_d), lambda i, k: (i, k)),
            pl.BlockSpec((block_n, tile_d), lambda i, k: (i, k)),
        ],
        out_specs=pl.BlockSpec((block_n, 1), lambda i, k: (i, 0)),
        scratch_shapes=[
            pltpu.VMEM((block_n, 1), jnp.float32),
            pltpu.VMEM((block_n, 1), jnp.float32),
        ],
        compiler_params=pltpu.CompilerParams(
            dimension_semantics=("parallel", "arbitrary"),
            vmem_limit_bytes=vmem_limit,
        ),
        cost_estimate=pl.CostEstimate(
            flops=3 * n * d,
            transcendentals=0,
            bytes_accessed=n * d * esz + n * 4,
        ),
    )(m1, m2)
    return score[:, 0]


def _ref(output, mask):
    n = output.shape[0]
    m1 = output.reshape(n, -1).astype(jnp.float32)
    m2 = mask.reshape(n, -1).astype(jnp.float32)
    return (jnp.sum(m1 * m2, axis=1) + 1e-08) / (jnp.sum(m2, axis=1) + 1e-08)


if __name__ == "__main__":
    key = jax.random.PRNGKey(0)
    k1, k2, k3, k4, k5, k6, k7, k8 = jax.random.split(key, 8)

    # Case 1: N=2, C=4, H=W=16 (D=1024) — lane-aligned single-tile path.
    out1 = jax.random.uniform(k1, (2, 4, 16, 16), dtype=jnp.float32)
    msk1 = (jax.random.uniform(k2, (2, 4, 16, 16)) > 0.5).astype(jnp.float32)
    s1 = myloss(out1, msk1)
    jax.block_until_ready(s1)
    assert jnp.allclose(s1, _ref(out1, msk1), rtol=1e-5, atol=1e-6), s1

    # Case 2: ragged D (=300), N=3 — full-extent (non-multiple-of-128) block.
    out2 = jax.random.uniform(k3, (3, 3, 10, 10), dtype=jnp.float32)
    msk2 = (jax.random.uniform(k4, (3, 3, 10, 10)) > 0.5).astype(jnp.float32)
    s2 = myloss(out2, msk2)
    jax.block_until_ready(s2)
    assert jnp.allclose(s2, _ref(out2, msk2), rtol=1e-5, atol=1e-6), s2

    # Case 3: small block budget forces multi-tile reduction with a masked
    # partial last tile AND a partial batch boundary block (N=10, block_n=8).
    out3 = jax.random.uniform(k5, (10, 3, 37, 41), dtype=jnp.float32)
    msk3 = (jax.random.uniform(k6, (10, 3, 37, 41)) > 0.5).astype(jnp.float32)
    s3 = myloss(out3, msk3, target_block_bytes=64 * 1024)
    jax.block_until_ready(s3)
    assert jnp.allclose(s3, _ref(out3, msk3), rtol=1e-5, atol=1e-6), s3

    # Case 4: low-precision contract — bf16 output, bool mask (cast in-kernel).
    out4 = jax.random.uniform(k7, (4, 4, 16, 16)).astype(jnp.bfloat16)
    msk4 = jax.random.uniform(k8, (4, 4, 16, 16)) > 0.5
    s4 = myloss(out4, msk4)
    jax.block_until_ready(s4)
    assert jnp.allclose(s4, _ref(out4, msk4), rtol=1e-3, atol=1e-5), s4

    print("KERNEL_OK")
</pallas_src>

<mosaic_0001>
module attributes {stable_mosaic.version = 11 : i64} {
  func.func @_myloss_kernel(%arg0: i32, %arg1: i32, %arg2: memref<2x1024xf32, #tpu.memory_space<vmem>>, %arg3: memref<2x1024xf32, #tpu.memory_space<vmem>>, %arg4: memref<2x1xf32, #tpu.memory_space<vmem>>, %arg5: memref<2x1xf32, #tpu.memory_space<vmem>>, %arg6: memref<2x1xf32, #tpu.memory_space<vmem>>) attributes {dimension_semantics = [#tpu.dimension_semantics<parallel>, #tpu.dimension_semantics<arbitrary>], iteration_bounds = array<i64: 1, 1>, scalar_prefetch = 0 : i64, scratch_operands = 2 : i64, tpu.core_type = #tpu.core_type<tc>, window_params = [{transform_indices = @transform_0, window_bounds = array<i64: 2, 1024>}, {transform_indices = @transform_1, window_bounds = array<i64: 2, 1024>}, {transform_indices = @transform_2, window_bounds = array<i64: 2, 1>}]} {
    %c0_i32 = arith.constant 0 : i32
    %0 = arith.cmpi eq, %arg1, %c0_i32 : i32
    %1 = arith.extui %0 : i1 to i32
    %c0_i32_0 = arith.constant 0 : i32
    %2 = arith.cmpi ne, %1, %c0_i32_0 : i32
    scf.if %2 {
      %cst_15 = arith.constant 0.000000e+00 : f32
      %19 = vector.broadcast %cst_15 : f32 to vector<2x1xf32>
      %c0_16 = arith.constant 0 : index
      %c0_17 = arith.constant 0 : index
      %20 = vector.load %arg5[%c0_16, %c0_17] : memref<2x1xf32, #tpu.memory_space<vmem>>, vector<2x1xf32>
      tpu.vector_store %arg5[%c0_16, %c0_17], %19 {strides = array<i32>} : memref<2x1xf32, #tpu.memory_space<vmem>>, vector<2x1xf32>,
      %cst_18 = arith.constant 0.000000e+00 : f32
      %21 = vector.broadcast %cst_18 : f32 to vector<2x1xf32>
      %c0_19 = arith.constant 0 : index
      %c0_20 = arith.constant 0 : index
      %22 = vector.load %arg6[%c0_19, %c0_20] : memref<2x1xf32, #tpu.memory_space<vmem>>, vector<2x1xf32>
      tpu.vector_store %arg6[%c0_19, %c0_20], %21 {strides = array<i32>} : memref<2x1xf32, #tpu.memory_space<vmem>>, vector<2x1xf32>,
    } else {
    }
    %c0 = arith.constant 0 : index
    %c0_1 = arith.constant 0 : index
    %3 = vector.load %arg2[%c0, %c0_1] : memref<2x1024xf32, #tpu.memory_space<vmem>>, vector<2x1024xf32>
    %c0_2 = arith.constant 0 : index
    %c0_3 = arith.constant 0 : index
    %4 = vector.load %arg3[%c0_2, %c0_3] : memref<2x1024xf32, #tpu.memory_space<vmem>>, vector<2x1024xf32>
    %5 = arith.mulf %3, %4 : vector<2x1024xf32>
    %c0_4 = arith.constant 0 : index
    %c0_5 = arith.constant 0 : index
    %6 = vector.load %arg5[%c0_4, %c0_5] : memref<2x1xf32, #tpu.memory_space<vmem>>, vector<2x1xf32>
    %cst = arith.constant dense<0.000000e+00> : vector<2xf32>
    %7 = vector.multi_reduction <add>, %5, %cst [1] : vector<2x1024xf32> to vector<2xf32>
    %8 = vector.shape_cast %7 : vector<2xf32> to vector<2x1xf32>
    %9 = arith.addf %6, %8 : vector<2x1xf32>
    %c0_6 = arith.constant 0 : index
    %c0_7 = arith.constant 0 : index
    %10 = vector.load %arg5[%c0_6, %c0_7] : memref<2x1xf32, #tpu.memory_space<vmem>>, vector<2x1xf32>
    tpu.vector_store %arg5[%c0_6, %c0_7], %9 {strides = array<i32>} : memref<2x1xf32, #tpu.memory_space<vmem>>, vector<2x1xf32>,
    %c0_8 = arith.constant 0 : index
    %c0_9 = arith.constant 0 : index
    %11 = vector.load %arg6[%c0_8, %c0_9] : memref<2x1xf32, #tpu.memory_space<vmem>>, vector<2x1xf32>
    %cst_10 = arith.constant dense<0.000000e+00> : vector<2xf32>
    %12 = vector.multi_reduction <add>, %4, %cst_10 [1] : vector<2x1024xf32> to vector<2xf32>
    %13 = vector.shape_cast %12 : vector<2xf32> to vector<2x1xf32>
    %14 = arith.addf %11, %13 : vector<2x1xf32>
    %c0_11 = arith.constant 0 : index
    %c0_12 = arith.constant 0 : index
    %15 = vector.load %arg6[%c0_11, %c0_12] : memref<2x1xf32, #tpu.memory_space<vmem>>, vector<2x1xf32>
    tpu.vector_store %arg6[%c0_11, %c0_12], %14 {strides = array<i32>} : memref<2x1xf32, #tpu.memory_space<vmem>>, vector<2x1xf32>,
    %c0_i32_13 = arith.constant 0 : i32
    %16 = arith.cmpi eq, %arg1, %c0_i32_13 : i32
    %17 = arith.extui %16 : i1 to i32
    %c0_i32_14 = arith.constant 0 : i32
    %18 = arith.cmpi ne, %17, %c0_i32_14 : i32
    scf.if %18 {
      %c0_15 = arith.constant 0 : index
      %c0_16 = arith.constant 0 : index
      %19 = vector.load %arg5[%c0_15, %c0_16] : memref<2x1xf32, #tpu.memory_space<vmem>>, vector<2x1xf32>
      %cst_17 = arith.constant 9.99999993E-9 : f32
      %20 = vector.broadcast %cst_17 : f32 to vector<2x1xf32>
      %21 = arith.addf %19, %20 : vector<2x1xf32>
      %c0_18 = arith.constant 0 : index
      %c0_19 = arith.constant 0 : index
      %22 = vector.load %arg6[%c0_18, %c0_19] : memref<2x1xf32, #tpu.memory_space<vmem>>, vector<2x1xf32>
      %cst_20 = arith.constant 9.99999993E-9 : f32
      %23 = vector.broadcast %cst_20 : f32 to vector<2x1xf32>
      %24 = arith.addf %22, %23 : vector<2x1xf32>
      %25 = arith.divf %21, %24 : vector<2x1xf32>
      %c0_21 = arith.constant 0 : index
      %c0_22 = arith.constant 0 : index
      %26 = vector.load %arg4[%c0_21, %c0_22] : memref<2x1xf32, #tpu.memory_space<vmem>>, vector<2x1xf32>
      tpu.vector_store %arg4[%c0_21, %c0_22], %25 {strides = array<i32>} : memref<2x1xf32, #tpu.memory_space<vmem>>, vector<2x1xf32>,
    } else {
    }
    return
  }
  func.func @transform_0(%arg0: i32, %arg1: i32) -> (i32, i32) {
    %c0_i32 = arith.constant 0 : i32
    return %arg0, %arg1 : i32, i32
  }
  func.func @transform_1(%arg0: i32, %arg1: i32) -> (i32, i32) {
    %c0_i32 = arith.constant 0 : i32
    return %arg0, %arg1 : i32, i32
  }
  func.func @transform_2(%arg0: i32, %arg1: i32) -> (i32, i32) {
    %c0_i32 = arith.constant 0 : i32
    %c0_i32_0 = arith.constant 0 : i32
    return %arg0, %c0_i32 : i32, i32
  }
}

</mosaic_0001>

<bundles_post_ra>
// kernel: tpu_custom_call.1
= control target key start
LH: loop header
LB: loop body
LE: loop exit
PB: predicated region body
PF: predicated region fallthrough
CT: control target
= control target key end

     0   :  { %7 = vsyncpa [#allocation5], 0  ;;  %s317_s0 = inlined_call_operand.hbm [shape: f32[2,1024], index: 0, kind: input, shape index: {}]   ;;  %s318_s1 = inlined_call_operand.hbm [shape: f32[2,1024], index: 1, kind: input, shape index: {}]   ;;  %s319_s2 = inlined_call_operand.vmem [shape: f32[2,1], index: 2, kind: output, shape index: {}]  }
   0x1   :  { %8 = vsyncpa [#allocation7], 0  ;;  %s250_s9 = smov [#allocation4]   ;;  %s251_s11 = smov [#allocation6]  }
   0x2   :  { %s15_s10 = sshll.u32 %s250_s9, 4  ;;  %s25_s12 = sshll.u32 %s251_s11, 4  ;;  %s16_s10 = int_to_ptr.vmem [resolvable:$true] %s15_s10  ;;  %s26_s12 = int_to_ptr.vmem [resolvable:$true] %s25_s12 }
   0x3   :  { %s202_s15 = scalar_lea.hbm %s317_s0, 256 }
   0x4   :  { %p203_p0 = scmp.ne.s32.totalorder %s317_s0, %s202_s15  ;;  %p206_p1 = scmp.lt.u32.totalorder %s202_s15, %s317_s0 }
   0x6   :  { %p208_p2 = pnand %p206_p1, %p203_p0 }
   0x8   :  { %211 = shalt.err (!%p208_p2)
}
   0x9   :  { %s212_s20 = scalar_lea.vmem %s16_s10, 256  ;;  %p217_p4 = scmp.lt.s32.totalorder %s16_s10, %s16_s10 }
   0xa   :  { %p213_p3 = scmp.ne.s32.totalorder %s16_s10, %s212_s20  ;;  %p218_p5 = scmp.lt.s32.totalorder %s212_s20, %s212_s20 }
   0xc   :  { %p219_p6 = por %p218_p5, %p217_p4 }
   0xe   :  { %p220_p7 = pnand %p219_p6, %p213_p3 }
  0x10   :  { %223 = shalt.err (!%p220_p7)
}
  0x11   :  { %18 = dma.hbm_to_vmem [thread:$0]  %s317_s0, 256, %s16_s10, [#allocation5]  }
  0x12   :  { %s224_s25 = scalar_lea.hbm %s318_s1, 256 }
  0x13   :  { %p225_p8 = scmp.ne.s32.totalorder %s318_s1, %s224_s25  ;;  %p228_p9 = scmp.lt.u32.totalorder %s224_s25, %s318_s1 }
  0x15   :  { %p230_p10 = pnand %p228_p9, %p225_p8 }
  0x17   :  { %233 = shalt.err (!%p230_p10)
}
  0x18   :  { %s234_s30 = scalar_lea.vmem %s26_s12, 256  ;;  %p239_p12 = scmp.lt.s32.totalorder %s26_s12, %s26_s12 }
  0x19   :  { %p235_p11 = scmp.ne.s32.totalorder %s26_s12, %s234_s30  ;;  %p240_p13 = scmp.lt.s32.totalorder %s234_s30, %s234_s30 }
  0x1b   :  { %p241_p0 = por %p240_p13, %p239_p12 }
  0x1d   :  { %p242_p1 = pnand %p241_p0, %p235_p11 }
  0x1f   :  { %245 = shalt.err (!%p242_p1)
}
  0x20   :  { %28 = dma.hbm_to_vmem [thread:$0]  %s318_s1, 256, %s26_s12, [#allocation7]  }
  0x21   :  { %246 = dma.done.wait [#allocation5], 256  }
  0x22   :  { %247 = vsyncadd [#allocation5], 4294967040 }
  0x23   :  { %248 = dma.done.wait [#allocation7], 256  }
  0x24   :  { %249 = vsyncadd [#allocation7], 4294967040  ;;  %v55_v0 = vlaneseq  ;;  %vm39_vm0 = vcmask 1024   ;;  %v252_v1 = vmov 1983009808   ;;  %v253_v4 = vmov 0.0  }
  0x25   :  { %v53_v2 = vunpack.c.l.s4 %v252_v1  ;;  %41 = vst.msk [vmem:[#allocation3] sm:$0x3] %vm39_vm0, %v253_v4  ;;  %40 = vst.msk [vmem:[#allocation2] sm:$0x3] %vm39_vm0, %v253_v4  ;;  %v44_v7 = vld [vmem:[#allocation6] sm:$0xff]  ;;  %v45_v8 = vld [vmem:[#allocation6 + $0x8] sm:$0xff] }
  0x26   :  { %v56_v3 = vshrl.u32 %v55_v0, 7  ;;  %v42_v9 = vld [vmem:[#allocation4] sm:$0xff]  ;;  %vm93_vm1 = vcmask 1041408   ;;  %v117_v10 = vcombine.high %v44_v7, %v44_v7  ;;  %v43_v12 = vld [vmem:[#allocation4 + $0x8] sm:$0xff]  ;;  %v134_v13 = vcombine.high %v45_v8, %v45_v8 }
  0x27   :  { %v54_v5 = vunpack.c.0.s8 %v53_v2  ;;  %v46_v14 = vmul.f32 %v44_v7, %v42_v9  ;;  %v47_v19 = vmul.f32 %v45_v8, %v43_v12 }
  0x29   :  { %v57_v6 = vsub.s32 %v54_v5, %v56_v3  ;;  %v51_v20 = vcombine.high %v46_v14, %v46_v14  ;;  %v68_v31 = vcombine.high %v47_v19, %v47_v19 }
  0x2b   :  { %v124_v11 = vrot.slane %v44_v7, %v57_v6  ;;  %v131_v15 = vrot.slane %v117_v10, %v57_v6  ;;  %v141_v17 = vrot.slane %v45_v8, %v57_v6  ;;  %v58_v21 = vrot.slane %v46_v14, %v57_v6 }
  0x2c   :  { %v148_v25 = vrot.slane %v134_v13, %v57_v6  ;;  %v65_v27 = vrot.slane %v51_v20, %v57_v6  ;;  %v75_v34 = vrot.slane %v47_v19, %v57_v6  ;;  %v82_v43 = vrot.slane %v68_v31, %v57_v6  ;;  %v114_v63 = vld [vmem:[#allocation3] sm:$0x3]  ;;  %v48_v2 = vld [vmem:[#allocation2] sm:$0x3] }
  0x2d   :  { %v132_v16 = vcombine.high %v124_v11, %v124_v11  ;;  %v159_v18 = vsel %vm93_vm1, %v124_v11, 0.0  ;;  %v133_v22 = vcombine.high %v131_v15, %v131_v15  ;;  %v162_v24 = vsel %vm93_vm1, %v131_v15, 0.0 }
  0x2e   :  { %v149_v28 = vcombine.high %v141_v17, %v141_v17  ;;  %v66_v30 = vcombine.high %v58_v21, %v58_v21  ;;  %v67_v33 = vcombine.high %v65_v27, %v65_v27  ;;  %v94_v35 = vsel %vm93_vm1, %v58_v21, 0.0 }
  0x2f   :  { %v160_v23 = vsel %vm93_vm1, %v132_v16, 0.0  ;;  %v164_v29 = vsel %vm93_vm1, %v133_v22, 0.0  ;;  %v166_v36 = vsel %vm93_vm1, %v141_v17, 0.0  ;;  %v97_v38 = vsel %vm93_vm1, %v65_v27, 0.0 }
  0x30   :  { %v161_v26 = vadd.f32 %v160_v23, %v159_v18  ;;  %v95_v37 = vsel %vm93_vm1, %v66_v30, 0.0  ;;  %v150_v39 = vcombine.high %v148_v25, %v148_v25  ;;  %v168_v42 = vsel %vm93_vm1, %v149_v28, 0.0 }
  0x31   :  { %v96_v41 = vadd.f32 %v95_v37, %v94_v35  ;;  %v83_v44 = vcombine.high %v75_v34, %v75_v34  ;;  %v99_v45 = vsel %vm93_vm1, %v67_v33, 0.0  ;;  %v170_v48 = vsel %vm93_vm1, %v148_v25, 0.0 }
  0x32   :  { %v163_v32 = vadd.f32 %v162_v24, %v161_v26  ;;  %v101_v49 = vsel %vm93_vm1, %v75_v34, 0.0  ;;  %v172_v52 = vsel %vm93_vm1, %v150_v39, 0.0  ;;  %v84_v53 = vcombine.high %v82_v43, %v82_v43 }
  0x33   :  { %v98_v47 = vadd.f32 %v97_v38, %v96_v41  ;;  %v103_v54 = vsel %vm93_vm1, %v83_v44, 0.0  ;;  %v105_v57 = vsel %vm93_vm1, %v82_v43, 0.0 }
  0x34   :  { %v165_v40 = vadd.f32 %v164_v29, %v163_v32  ;;  %v107_v60 = vsel %vm93_vm1, %v84_v53, 0.0 }
  0x35   :  { %v100_v51 = vadd.f32 %v99_v45, %v98_v47 }
  0x36   :  { %v167_v46 = vadd.f32 %v166_v36, %v165_v40 }
  0x37   :  { %v102_v56 = vadd.f32 %v101_v49, %v100_v51 }
  0x38   :  { %v169_v50 = vadd.f32 %v168_v42, %v167_v46 }
  0x39   :  { %v104_v59 = vadd.f32 %v103_v54, %v102_v56 }
  0x3a   :  { %v171_v55 = vadd.f32 %v170_v48, %v169_v50 }
  0x3b   :  { %v106_v61 = vadd.f32 %v105_v57, %v104_v59 }
  0x3c   :  { %v173_v58 = vadd.f32 %v172_v52, %v171_v55 }
  0x3d   :  { %v108_v62 = vadd.f32 %v107_v60, %v106_v61 }
  0x3e   :  { %174 = vadd.xlane.f32.xlu0 %v173_v58 }
  0x42   :  { %109 = vadd.xlane.f32.xlu0 %v108_v62 }
  0xcb   :  { %v175_v0 = vpop.xlane.xlu0 %174 }
  0xcc   :  { %v176_v1 = vadd.f32 %v175_v0, %v114_v63 }
  0xce   :  { %177 = vst.msk [vmem:[#allocation3] sm:$0x3] %vm39_vm0, %v176_v1 }
  0xcf   :  { %v110_v3 = vpop.xlane.xlu0 %109 }
  0xd0   :  { %v111_v4 = vadd.f32 %v110_v3, %v48_v2 }
  0xd2   :  { %113 = vst.msk [vmem:[#allocation2] sm:$0x3] %vm39_vm0, %v111_v4 }
  0xd5   :  { %v183_v5 = vld [vmem:[#allocation3] sm:$0x3] }
  0xd6   :  { %v184_v6 = vadd.f32 1e-08, %v183_v5 }
  0xd8   :  { %200 = vrcp.f32 %v184_v6 }
  0xd9   :  { %v181_v7 = vld [vmem:[#allocation2] sm:$0x3] }
  0xda   :  { %v182_v8 = vadd.f32 1e-08, %v181_v7 }
  0xe2   :  { %v201_v9 = vpop.eup %200 }
  0xe3   :  { %v186_v10 = vmul.f32 %v201_v9, %v182_v8 }
  0xe5   :  { %187 = vst.msk [vmem:[%s319_s2] sm:$0x3] %vm39_vm0, %v186_v10 }
  0xe6   :  { %192 = vsyncpa [#allocation5], 1 }
  0xe7   :  { %193 = vsyncpa [#allocation7], 1 }

</bundles_post_ra>
